<compile_context>
chip_gen: v7x
topology: tpu7x:2x2x1
jax: 0.10.0
libtpu: 0.0.40
codegen_flags: <defaults>
</compile_context>

<pallas_src>
import functools

import jax
import jax.numpy as jnp
from jax.experimental import pallas as pl
from jax.experimental.pallas import tpu as pltpu

LANE = 128          # TPU lane width
BLOCK_B_CAP = 1024  # max batch rows per grid step (amortizes ~0.35us/step overhead)


def _round_up(x, m):
    return ((x + m - 1) // m) * m


def _choose_block_b(B):
    # 16-aligned blocks (bf16 packs (16,128) per vreg tile). One grid step for
    # small B (launch-overhead-bound anyway); for B >= 128 split into >= 2
    # steps so the "parallel" grid axis shards across both v7x TensorCores,
    # capped at BLOCK_B_CAP.
    if B < 128:
        return _round_up(B, 16)
    half = _round_up(pl.cdiv(B, 2), 16)
    return min(half, BLOCK_B_CAP)


def qnetwork_kernel(x_ref, w0_ref, b0_ref, w1_ref, b1_ref, w2_ref, b2_ref, o_ref):
    # Layer 0 in f32 (K = in_features is tiny; closest parity to f32 reference).
    h0 = jnp.dot(x_ref[...], w0_ref[...], preferred_element_type=jnp.float32) + b0_ref[...]
    h0 = jnp.maximum(h0, 0.0).astype(jnp.bfloat16)  # VPU cast rides a free slot
    # Layers 1/2: bf16 MXU operands, f32 accumulation, f32 bias/ReLU.
    h1 = jnp.dot(h0, w1_ref[...], preferred_element_type=jnp.float32) + b1_ref[...]
    h1 = jnp.maximum(h1, 0.0).astype(jnp.bfloat16)
    out = jnp.dot(h1, w2_ref[...], preferred_element_type=jnp.float32) + b2_ref[...]
    o_ref[...] = out.astype(o_ref.dtype)  # lane-dense bf16 (block_b, out_pad) store


def prepare_qnetwork_params(w0, b0, w1, b1, w2, b2):
    """One-time parameter prep (run outside the per-call forward):
    lane-pad w2/b2 to a multiple of 128 output columns, cast layer-1/2
    weights to bf16.  Returns (params_tuple, out_features)."""
    out_features = w2.shape[1]
    out_pad = _round_up(out_features, LANE)
    if out_pad != out_features:
        w2 = jnp.pad(w2, ((0, 0), (0, out_pad - out_features)))
        b2 = jnp.pad(b2, ((0, 0), (0, out_pad - out_features)))
    params = (
        w0.astype(jnp.float32),   # layer 0 stays f32
        b0.astype(jnp.float32),
        w1.astype(jnp.bfloat16),
        b1.astype(jnp.float32),
        w2.astype(jnp.bfloat16),  # lane-padded
        b2.astype(jnp.float32),   # lane-padded
    )
    return params, out_features


@functools.partial(jax.jit, static_argnames=("out_features",))
def qnetwork_forward(x, params, *, out_features):
    w0, b0, w1_b, b1, w2_b, b2_p = params
    B, in_features = x.shape
    hidden = w1_b.shape[0]
    out_pad = w2_b.shape[1]

    block_b = _choose_block_b(B)
    b_pad = _round_up(B, block_b)
    x_p = x if b_pad == B else jnp.pad(x, ((0, b_pad - B), (0, 0)))

    grid = (b_pad // block_b,)
    # Weights/biases: full-array blocks with a constant block index -> DMA'd
    # once, resident in VMEM across the whole grid.
    full2d = lambda r, c: pl.BlockSpec((r, c), lambda i: (0, 0))

    out = pl.pallas_call(
        qnetwork_kernel,
        out_shape=jax.ShapeDtypeStruct((b_pad, out_pad), jnp.bfloat16),
        grid_spec=pltpu.PrefetchScalarGridSpec(
            num_scalar_prefetch=0,
            grid=grid,
            in_specs=[
                pl.BlockSpec((block_b, in_features), lambda i: (i, 0)),  # x (f32)
                full2d(in_features, hidden),                              # w0 (f32)
                full2d(1, hidden),                                        # b0 (f32)
                full2d(hidden, hidden),                                   # w1 (bf16)
                full2d(1, hidden),                                        # b1 (f32)
                full2d(hidden, out_pad),                                  # w2 (bf16, lane-padded)
                full2d(1, out_pad),                                       # b2 (f32, lane-padded)
            ],
            out_specs=pl.BlockSpec((block_b, out_pad), lambda i: (i, 0)),
        ),
        compiler_params=pltpu.CompilerParams(
            # Batch axis is independent -> megacore sharding on v7x when grid > 1.
            dimension_semantics=("parallel",),
        ),
    )(x_p, w0, b0, w1_b, b1, w2_b, b2_p)

    # Strip batch/lane padding; slice + bf16->f32 cast fuse into one op under jit.
    # (Callers that fuse an argmax downstream could consume the padded bf16 slab
    #  directly, masking the padded columns.)
    return out[:B, :out_features].astype(jnp.float32)


def init_linear_params(key, in_f, out_f):
    # Deterministic init mimicking PyTorch nn.Linear defaults:
    # uniform(-1/sqrt(fan_in), 1/sqrt(fan_in)) for both weight and bias.
    kw, kb = jax.random.split(key)
    bound = 1.0 / jnp.sqrt(jnp.float32(in_f))
    # Stored as [in, out] (transposed relative to PyTorch's [out, in]).
    w = jax.random.uniform(kw, (in_f, out_f), jnp.float32, -bound, bound)
    b = jax.random.uniform(kb, (1, out_f), jnp.float32, -bound, bound)
    return w, b


def reference_forward(x, w0, b0, w1, b1, w2, b2):
    # Pure-f32 JAX reference (PyTorch semantics).
    h0 = jnp.maximum(x @ w0 + b0, 0.0)
    h1 = jnp.maximum(h0 @ w1 + b1, 0.0)
    return h1 @ w2 + b2


if __name__ == "__main__":
    # Shapes consistent with the global-routing DQN usage: small state vector
    # in, small action-value vector out, hidden width 128 fixed by the module.
    B = 16            # batch
    IN_FEATURES = 12  # state features
    HIDDEN = 128      # fixed in QNetwork.__init__
    OUT_FEATURES = 6  # actions

    key = jax.random.PRNGKey(0)
    kx, k0, k1, k2 = jax.random.split(key, 4)

    x = jax.random.normal(kx, (B, IN_FEATURES), jnp.float32)
    w0, b0 = init_linear_params(k0, IN_FEATURES, HIDDEN)
    w1, b1 = init_linear_params(k1, HIDDEN, HIDDEN)
    w2, b2 = init_linear_params(k2, HIDDEN, OUT_FEATURES)

    # One-time parameter preparation (hoisted out of the per-call forward).
    params, out_features = prepare_qnetwork_params(w0, b0, w1, b1, w2, b2)
    params = jax.block_until_ready(params)

    out = qnetwork_forward(x, params, out_features=out_features)
    out = jax.block_until_ready(out)

    ref = reference_forward(x, w0, b0, w1, b1, w2, b2)
    assert out.shape == (B, OUT_FEATURES)
    # bf16 operands in layers 1/2 + bf16 output store -> compare against the
    # f32 reference with a correspondingly looser tolerance.
    assert jnp.allclose(out, ref, atol=5e-2, rtol=5e-2), "mismatch vs JAX reference"

    print("KERNEL_OK")
</pallas_src>

<mosaic_0001>
module attributes {stable_mosaic.version = 11 : i64} {
  func.func @qnetwork_kernel(%arg0: i32, %arg1: memref<16x12xf32, #tpu.memory_space<vmem>>, %arg2: memref<12x128xf32, #tpu.memory_space<vmem>>, %arg3: memref<1x128xf32, #tpu.memory_space<vmem>>, %arg4: memref<128x128xbf16, #tpu.memory_space<vmem>>, %arg5: memref<1x128xf32, #tpu.memory_space<vmem>>, %arg6: memref<128x128xbf16, #tpu.memory_space<vmem>>, %arg7: memref<1x128xf32, #tpu.memory_space<vmem>>, %arg8: memref<16x128xbf16, #tpu.memory_space<vmem>>) attributes {dimension_semantics = [#tpu.dimension_semantics<parallel>], iteration_bounds = array<i64: 1>, scalar_prefetch = 0 : i64, scratch_operands = 0 : i64, tpu.core_type = #tpu.core_type<tc>, window_params = [{transform_indices = @transform_0, window_bounds = array<i64: 16, 12>}, {pipeline_mode = #tpu.pipeline_mode<synchronous>, transform_indices = @transform_1, window_bounds = array<i64: 12, 128>}, {pipeline_mode = #tpu.pipeline_mode<synchronous>, transform_indices = @transform_2, window_bounds = array<i64: 1, 128>}, {pipeline_mode = #tpu.pipeline_mode<synchronous>, transform_indices = @transform_3, window_bounds = array<i64: 128, 128>}, {pipeline_mode = #tpu.pipeline_mode<synchronous>, transform_indices = @transform_4, window_bounds = array<i64: 1, 128>}, {pipeline_mode = #tpu.pipeline_mode<synchronous>, transform_indices = @transform_5, window_bounds = array<i64: 128, 128>}, {pipeline_mode = #tpu.pipeline_mode<synchronous>, transform_indices = @transform_6, window_bounds = array<i64: 1, 128>}, {transform_indices = @transform_7, window_bounds = array<i64: 16, 128>}]} {
    %c0 = arith.constant 0 : index
    %c0_0 = arith.constant 0 : index
    %0 = vector.load %arg1[%c0, %c0_0] : memref<16x12xf32, #tpu.memory_space<vmem>>, vector<16x12xf32>
    %c0_1 = arith.constant 0 : index
    %c0_2 = arith.constant 0 : index
    %1 = vector.load %arg2[%c0_1, %c0_2] : memref<12x128xf32, #tpu.memory_space<vmem>>, vector<12x128xf32>
    %cst = arith.constant dense<0.000000e+00> : vector<16x128xf32>
    %2 = tpu.matmul %0, %1, %cst {dimension_numbers = #tpu.dot_dimension_numbers<[1], [0], [0], [1], [0, 0, 1, 1], [], []>} : vector<16x12xf32>, vector<12x128xf32>, vector<16x128xf32> -> vector<16x128xf32>
    %c0_3 = arith.constant 0 : index
    %c0_4 = arith.constant 0 : index
    %3 = vector.load %arg3[%c0_3, %c0_4] : memref<1x128xf32, #tpu.memory_space<vmem>>, vector<1x128xf32>
    %4 = vector.broadcast %3 : vector<1x128xf32> to vector<16x128xf32>
    %5 = arith.addf %2, %4 : vector<16x128xf32>
    %cst_5 = arith.constant 0.000000e+00 : f32
    %6 = vector.broadcast %cst_5 : f32 to vector<16x128xf32>
    %7 = arith.maximumf %5, %6 : vector<16x128xf32>
    %8 = arith.truncf %7 : vector<16x128xf32> to vector<16x128xbf16>
    %c0_6 = arith.constant 0 : index
    %c0_7 = arith.constant 0 : index
    %9 = vector.load %arg4[%c0_6, %c0_7] : memref<128x128xbf16, #tpu.memory_space<vmem>>, vector<128x128xbf16>
    %cst_8 = arith.constant dense<0.000000e+00> : vector<16x128xf32>
    %10 = tpu.matmul %8, %9, %cst_8 {dimension_numbers = #tpu.dot_dimension_numbers<[1], [0], [0], [1], [0, 0, 1, 1], [], []>} : vector<16x128xbf16>, vector<128x128xbf16>, vector<16x128xf32> -> vector<16x128xf32>
    %c0_9 = arith.constant 0 : index
    %c0_10 = arith.constant 0 : index
    %11 = vector.load %arg5[%c0_9, %c0_10] : memref<1x128xf32, #tpu.memory_space<vmem>>, vector<1x128xf32>
    %12 = vector.broadcast %11 : vector<1x128xf32> to vector<16x128xf32>
    %13 = arith.addf %10, %12 : vector<16x128xf32>
    %cst_11 = arith.constant 0.000000e+00 : f32
    %14 = vector.broadcast %cst_11 : f32 to vector<16x128xf32>
    %15 = arith.maximumf %13, %14 : vector<16x128xf32>
    %16 = arith.truncf %15 : vector<16x128xf32> to vector<16x128xbf16>
    %c0_12 = arith.constant 0 : index
    %c0_13 = arith.constant 0 : index
    %17 = vector.load %arg6[%c0_12, %c0_13] : memref<128x128xbf16, #tpu.memory_space<vmem>>, vector<128x128xbf16>
    %cst_14 = arith.constant dense<0.000000e+00> : vector<16x128xf32>
    %18 = tpu.matmul %16, %17, %cst_14 {dimension_numbers = #tpu.dot_dimension_numbers<[1], [0], [0], [1], [0, 0, 1, 1], [], []>} : vector<16x128xbf16>, vector<128x128xbf16>, vector<16x128xf32> -> vector<16x128xf32>
    %c0_15 = arith.constant 0 : index
    %c0_16 = arith.constant 0 : index
    %19 = vector.load %arg7[%c0_15, %c0_16] : memref<1x128xf32, #tpu.memory_space<vmem>>, vector<1x128xf32>
    %20 = vector.broadcast %19 : vector<1x128xf32> to vector<16x128xf32>
    %21 = arith.addf %18, %20 : vector<16x128xf32>
    %22 = arith.truncf %21 : vector<16x128xf32> to vector<16x128xbf16>
    %c0_17 = arith.constant 0 : index
    %c0_18 = arith.constant 0 : index
    %23 = vector.load %arg8[%c0_17, %c0_18] : memref<16x128xbf16, #tpu.memory_space<vmem>>, vector<16x128xbf16>
    tpu.vector_store %arg8[%c0_17, %c0_18], %22 {strides = array<i32>} : memref<16x128xbf16, #tpu.memory_space<vmem>>, vector<16x128xbf16>,
    return
  }
  func.func @transform_0(%arg0: i32) -> (i32, i32) {
    %c0_i32 = arith.constant 0 : i32
    %c0_i32_0 = arith.constant 0 : i32
    return %arg0, %c0_i32 : i32, i32
  }
  func.func @transform_1(%arg0: i32) -> (i32, i32) {
    %c0_i32 = arith.constant 0 : i32
    %c0_i32_0 = arith.constant 0 : i32
    %c0_i32_1 = arith.constant 0 : i32
    return %c0_i32, %c0_i32_0 : i32, i32
  }
  func.func @transform_2(%arg0: i32) -> (i32, i32) {
    %c0_i32 = arith.constant 0 : i32
    %c0_i32_0 = arith.constant 0 : i32
    %c0_i32_1 = arith.constant 0 : i32
    return %c0_i32, %c0_i32_0 : i32, i32
  }
  func.func @transform_3(%arg0: i32) -> (i32, i32) {
    %c0_i32 = arith.constant 0 : i32
    %c0_i32_0 = arith.constant 0 : i32
    %c0_i32_1 = arith.constant 0 : i32
    return %c0_i32, %c0_i32_0 : i32, i32
  }
  func.func @transform_4(%arg0: i32) -> (i32, i32) {
    %c0_i32 = arith.constant 0 : i32
    %c0_i32_0 = arith.constant 0 : i32
    %c0_i32_1 = arith.constant 0 : i32
    return %c0_i32, %c0_i32_0 : i32, i32
  }
  func.func @transform_5(%arg0: i32) -> (i32, i32) {
    %c0_i32 = arith.constant 0 : i32
    %c0_i32_0 = arith.constant 0 : i32
    %c0_i32_1 = arith.constant 0 : i32
    return %c0_i32, %c0_i32_0 : i32, i32
  }
  func.func @transform_6(%arg0: i32) -> (i32, i32) {
    %c0_i32 = arith.constant 0 : i32
    %c0_i32_0 = arith.constant 0 : i32
    %c0_i32_1 = arith.constant 0 : i32
    return %c0_i32, %c0_i32_0 : i32, i32
  }
  func.func @transform_7(%arg0: i32) -> (i32, i32) {
    %c0_i32 = arith.constant 0 : i32
    %c0_i32_0 = arith.constant 0 : i32
    return %arg0, %c0_i32 : i32, i32
  }
}

</mosaic_0001>

<bundles_post_ra>
// kernel: qnetwork_forward.1
= control target key start
LH: loop header
LB: loop body
LE: loop exit
PB: predicated region body
PF: predicated region fallthrough
CT: control target
= control target key end

     0   :  { %12 = vsyncpa [#allocation3], 0  ;;  %s791_s0 = inlined_call_operand.hbm [shape: f32[16,12], index: 0, kind: input, shape index: {}]   ;;  %s792_s1 = inlined_call_operand.hbm [shape: f32[12,128], index: 1, kind: input, shape index: {}]   ;;  %s793_s2 = inlined_call_operand.vmem [shape: f32[1,128], index: 2, kind: input, shape index: {}]   ;;  %s794_s3 = inlined_call_operand.hbm [shape: bf16[128,128], index: 3, kind: input, shape index: {}]   ;;  %s795_s4 = inlined_call_operand.vmem [shape: f32[1,128], index: 4, kind: input, shape index: {}]   ;;  %s796_s5 = inlined_call_operand.hbm [shape: bf16[128,128], index: 5, kind: input, shape index: {}]   ;;  %s797_s6 = inlined_call_operand.vmem [shape: f32[1,128], index: 6, kind: input, shape index: {}]   ;;  %s798_s7 = inlined_call_operand.vmem [shape: bf16[16,128], index: 7, kind: output, shape index: {}]  }
   0x1   :  { %13 = vsyncpa [#allocation5], 0 }
   0x2   :  { %14 = vsyncpa [#allocation8], 0  ;;  %s653_s24 = smov [#allocation4]   ;;  %s654_s26 = smov [#allocation2]  }
   0x3   :  { %s32_s25 = sshll.u32 %s653_s24, 4  ;;  %s20_s27 = sshll.u32 %s654_s26, 4  ;;  %s33_s25 = int_to_ptr.vmem [resolvable:$true] %s32_s25  ;;  %s704_s27 = int_to_ptr.vmem [resolvable:$true] %s20_s27 }
   0x4   :  { %s559_s30 = scalar_lea.hbm %s792_s1, 256 }
   0x5   :  { %p560_p0 = scmp.ne.s32.totalorder %s792_s1, %s559_s30  ;;  %p563_p1 = scmp.lt.u32.totalorder %s559_s30, %s792_s1 }
   0x7   :  { %p565_p2 = pnand %p563_p1, %p560_p0 }
   0x9   :  { %568 = shalt.err (!%p565_p2)
}
   0xa   :  { %s569_s12 = scalar_lea.vmem %s33_s25, 256  ;;  %p574_p4 = scmp.lt.s32.totalorder %s33_s25, %s33_s25 }
   0xb   :  { %p570_p3 = scmp.ne.s32.totalorder %s33_s25, %s569_s12  ;;  %p575_p5 = scmp.lt.s32.totalorder %s569_s12, %s569_s12 }
   0xd   :  { %p576_p6 = por %p575_p5, %p574_p4 }
   0xf   :  { %p577_p7 = pnand %p576_p6, %p570_p3 }
  0x11   :  { %580 = shalt.err (!%p577_p7)
}
  0x12   :  { %s655_s13 = smov 128   ;;  %s656_s14 = smov 8  }
  0x13   :  { %38 = dma.hbm_to_vmem [thread:$0]  %s792_s1, 256, %s33_s25, [#allocation5], %s655_s13, %s655_s13, %s656_s14  }
  0x14   :  { %s581_s19 = scalar_lea.hbm %s791_s0, 256 }
  0x15   :  { %p582_p8 = scmp.ne.s32.totalorder %s791_s0, %s581_s19  ;;  %p585_p9 = scmp.lt.u32.totalorder %s581_s19, %s791_s0 }
  0x17   :  { %p587_p10 = pnand %p585_p9, %p582_p8 }
  0x19   :  { %590 = shalt.err (!%p587_p10)
}
  0x1a   :  { %s591_s24 = scalar_lea.vmem %s704_s27, 256  ;;  %p596_p12 = scmp.lt.s32.totalorder %s704_s27, %s704_s27 }
  0x1b   :  { %p592_p11 = scmp.ne.s32.totalorder %s704_s27, %s591_s24  ;;  %p597_p13 = scmp.lt.s32.totalorder %s591_s24, %s591_s24 }
  0x1d   :  { %p598_p0 = por %p597_p13, %p596_p12 }
  0x1f   :  { %p599_p1 = pnand %p598_p0, %p592_p11 }
  0x21   :  { %602 = shalt.err (!%p599_p1)
}
  0x22   :  { %26 = dma.hbm_to_vmem [thread:$0]  %s791_s0, 256, %s704_s27, [#allocation3], %s655_s13, %s655_s13, %s656_s14  }
  0x23   :  { %s657_s26 = smov [#allocation6]   ;;  %s603_s8 = scalar_lea.hbm %s794_s3, 1024 }
  0x24   :  { %s46_s28 = sshll.u32 %s657_s26, 4  ;;  %p604_p2 = scmp.ne.s32.totalorder %s794_s3, %s603_s8  ;;  %s47_s28 = int_to_ptr.vmem [resolvable:$true] %s46_s28 }
  0x25   :  { %p607_p3 = scmp.lt.u32.totalorder %s603_s8, %s794_s3 }
  0x27   :  { %p609_p4 = pnand %p607_p3, %p604_p2 }
  0x29   :  { %612 = shalt.err (!%p609_p4)
}
  0x2a   :  { %s613_s15 = scalar_lea.vmem %s47_s28, 1024  ;;  %p618_p6 = scmp.lt.s32.totalorder %s47_s28, %s47_s28 }
  0x2b   :  { %p614_p5 = scmp.ne.s32.totalorder %s47_s28, %s613_s15  ;;  %p619_p7 = scmp.lt.s32.totalorder %s613_s15, %s613_s15 }
  0x2d   :  { %p620_p8 = por %p619_p7, %p618_p6 }
  0x2f   :  { %p621_p9 = pnand %p620_p8, %p614_p5 }
  0x31   :  { %624 = shalt.err (!%p621_p9)
}
  0x32   :  { %s658_s0 = smov 64   ;;  %s659_s27 = smov 4  }
  0x33   :  { %52 = dma.hbm_to_vmem [thread:$0]  %s794_s3, 1024, %s47_s28, [#allocation5], %s658_s0, %s658_s0, %s659_s27  }
  0x34   :  { %s660_s16 = smov [#allocation7]   ;;  %s625_s20 = scalar_lea.hbm %s796_s5, 1024 }
  0x35   :  { %s60_s17 = sshll.u32 %s660_s16, 4  ;;  %p626_p10 = scmp.ne.s32.totalorder %s796_s5, %s625_s20  ;;  %s61_s17 = int_to_ptr.vmem [resolvable:$true] %s60_s17 }
  0x36   :  { %p629_p11 = scmp.lt.u32.totalorder %s625_s20, %s796_s5 }
  0x38   :  { %p631_p12 = pnand %p629_p11, %p626_p10 }
  0x3a   :  { %634 = shalt.err (!%p631_p12)
}
  0x3b   :  { %s635_s1 = scalar_lea.vmem %s61_s17, 1024  ;;  %p640_p0 = scmp.lt.s32.totalorder %s61_s17, %s61_s17 }
  0x3c   :  { %p636_p13 = scmp.ne.s32.totalorder %s61_s17, %s635_s1  ;;  %p641_p1 = scmp.lt.s32.totalorder %s635_s1, %s635_s1 }
  0x3e   :  { %p642_p2 = por %p641_p1, %p640_p0 }
  0x40   :  { %p643_p3 = pnand %p642_p2, %p636_p13 }
  0x42   :  { %646 = shalt.err (!%p643_p3)
}
  0x43   :  { %66 = dma.hbm_to_vmem [thread:$0]  %s796_s5, 1024, %s61_s17, [#allocation8], %s658_s0, %s658_s0, %s659_s27  }
  0x44   :  { %647 = dma.done.wait [#allocation3], 256  }
  0x45   :  { %648 = vsyncadd [#allocation3], 4294967040 }
  0x46   :  { %649 = dma.done.wait [#allocation5], 1280  }
  0x47   :  { %650 = vsyncadd [#allocation5], 4294966016 }
  0x48   :  { %651 = dma.done.wait [#allocation8], 1024  }
  0x49   :  { %652 = vsyncadd [#allocation8], 4294966272  ;;  %v661_v0 = vmov 0.0   ;;  %vm100_vm0 = vcmask 1043456   ;;  %vm93_vm1 = vcmask 97280   ;;  %vm662_vm2 = vmmov 1  }
  0x4a   :  { %486 = vmatprep.subr.bf16.mxu1 %v661_v0  ;;  %vm527_vm3 = vmpackc.low %vm100_vm0, %vm662_vm2  ;;  %v84_v1 = vld [vmem:[#allocation4] sm:$0xff]  ;;  %v85_v2 = vld [vmem:[#allocation4 + $0x8] sm:$0xf]  ;;  %vm663_vm4 = vmmov 0  }
  0x4b   :  { %v82_v3 = vld [vmem:[#allocation2] sm:$0xff]  ;;  %v526_v4 = vpack.c.bf16 %v85_v2, %v84_v1  ;;  %v83_v6 = vld [vmem:[#allocation2 + $0x8] sm:$0xff]  ;;  %v545_v8 = vld [vmem:[#allocation6 + $0x10] sm:$0xff]   ;;  %502 = vmatprep.mubr.msk.bf16.mxu1 %vm663_vm4, %v661_v0 }
  0x4c   :  { %483 = vmatprep.mubr.msk.f32.mxu0 %vm93_vm1, %v82_v3  ;;  %v543_v5 = vld [vmem:[#allocation6] sm:$0xff]   ;;  %v544_v7 = vld [vmem:[#allocation6 + $0x8] sm:$0xff]   ;;  %v546_v9 = vld [vmem:[#allocation6 + $0x18] sm:$0xff]  }
  0x4d   :  { %528 = vmatprep.subr.msk.bf16.mxu0 %vm527_vm3, %v526_v4  ;;  %487 = vmatpush3.bf16.msra.mxu1 %v543_v5  ;;  %v547_v10 = vld [vmem:[#allocation6 + $0x20] sm:$0xff]   ;;  %v548_v11 = vld [vmem:[#allocation6 + $0x28] sm:$0xff]   ;;  %v549_v12 = vld [vmem:[#allocation6 + $0x30] sm:$0xff]  }
  0x4e   :  { %531 = vmatpush3.bf16.msk.msra.mxu0 %vm527_vm3, %v526_v4  ;;  %488 = vmatprep.subr.bf16.mxu1 %v661_v0  ;;  %v550_v13 = vld [vmem:[#allocation6 + $0x38] sm:$0xff]   ;;  %v551_v14 = vld [vmem:[#allocation7] sm:$0xff]   ;;  %v552_v15 = vld [vmem:[#allocation7 + $0x8] sm:$0xff]  }
  0x4f   :  { %506 = vmatprep.subr.bf16.mxu0 %v661_v0  ;;  %v553_v16 = vld [vmem:[#allocation7 + $0x10] sm:$0xff]   ;;  %v554_v17 = vld [vmem:[#allocation7 + $0x18] sm:$0xff]   ;;  %v555_v18 = vld [vmem:[#allocation7 + $0x20] sm:$0xff]  }
  0x50   :  { %v556_v19 = vld [vmem:[#allocation7 + $0x28] sm:$0xff]   ;;  %v426_v20 = vld [vmem:[%s793_s2] ss:$0 sm:$0xff]  ;;  %v557_v28 = vld [vmem:[#allocation7 + $0x30] sm:$0xff]  }
  0x51   :  { %484 = vmatmul.mubr.msk.f32.vlgmr.msra.gmra.mrb[0].mxu0 %vm93_vm1, %v83_v6  ;;  %489 = vmatpush3.bf16.msra.mxu1 %v544_v7  ;;  %v558_v29 = vld [vmem:[#allocation7 + $0x38] sm:$0xff]   ;;  %v430_v30 = vld [vmem:[%s795_s4] ss:$0 sm:$0xff] }
  0x52   :  { %490 = vmatprep.subr.bf16.mxu1 %v661_v0  ;;  %522 = vmatprep.mubr.msk.bf16.mxu0 %vm663_vm4, %v661_v0  ;;  %v439_v40 = vld [vmem:[%s797_s6] ss:$0 sm:$0xff] }
  0x53   :  { %507 = vmatpush3.bf16.msra.mxu0 %v551_v14 }
  0x54   :  { %508 = vmatprep.subr.bf16.mxu0 %v661_v0 }
  0x55   :  { %491 = vmatpush3.bf16.msra.mxu1 %v545_v8 }
  0x56   :  { %492 = vmatprep.subr.bf16.mxu1 %v661_v0 }
  0x57   :  { %509 = vmatpush3.bf16.msra.mxu0 %v552_v15 }
  0x58   :  { %510 = vmatprep.subr.bf16.mxu0 %v661_v0 }
  0x59   :  { %493 = vmatpush3.bf16.msra.mxu1 %v546_v9 }
  0x5a   :  { %494 = vmatprep.subr.bf16.mxu1 %v661_v0 }
  0x5b   :  { %511 = vmatpush3.bf16.msra.mxu0 %v553_v16 }
  0x5c   :  { %512 = vmatprep.subr.bf16.mxu0 %v661_v0 }
  0x5d   :  { %495 = vmatpush3.bf16.msra.mxu1 %v547_v10 }
  0x5e   :  { %496 = vmatprep.subr.bf16.mxu1 %v661_v0 }
  0x5f   :  { %513 = vmatpush3.bf16.msra.mxu0 %v554_v17 }
  0x60   :  { %514 = vmatprep.subr.bf16.mxu0 %v661_v0 }
  0x61   :  { %497 = vmatpush3.bf16.msra.mxu1 %v548_v11 }
  0x62   :  { %498 = vmatprep.subr.bf16.mxu1 %v661_v0 }
  0x63   :  { %515 = vmatpush3.bf16.msra.mxu0 %v555_v18 }
  0x64   :  { %516 = vmatprep.subr.bf16.mxu0 %v661_v0 }
  0x65   :  { %499 = vmatpush3.bf16.msra.mxu1 %v549_v12 }
  0x66   :  { %500 = vmatprep.subr.bf16.mxu1 %v661_v0 }
  0x67   :  { %517 = vmatpush3.bf16.msra.mxu0 %v556_v19 }
  0x68   :  { %518 = vmatprep.subr.bf16.mxu0 %v661_v0 }
  0x69   :  { %501 = vmatpush3.bf16.msra.mxu1 %v550_v13 }
  0x6b   :  { %519 = vmatpush3.bf16.msra.mxu0 %v557_v28 }
  0x6c   :  { %520 = vmatprep.subr.bf16.mxu0 %v661_v0 }
  0x6f   :  { %521 = vmatpush3.bf16.msra.mxu0 %v558_v29 }
 0x124   :  { %v485_v21 = vpop.f32.mrb[0].mxu0 }
 0x125   :  { %v176_v22 = vadd.f32 %v485_v21, %v426_v20  ;;  %v170_v23 = vpop.f32.mrb[1].mxu0 }
 0x126   :  { %v171_v24 = vadd.f32 %v426_v20, %v170_v23 }
 0x127   :  { %v180_v25 = vmax.f32 %v176_v22, 0.0 }
 0x128   :  { %v179_v26 = vmax.f32 %v171_v24, 0.0 }
 0x12a   :  { %v181_v27 = vpack.c.bf16 %v180_v25, %v179_v26 }
 0x12c   :  { %503 = vmatmul.mubr.bf16.vlgmr.msra.gmra.mrb[0].mxu1 %v181_v27 }
 0x1ff   :  { %v287_v31 = vpop.f32.mrb[0].mxu1 }
 0x200   :  { %v288_v32 = vadd.f32 %v430_v30, %v287_v31  ;;  %v504_v33 = vpop.f32.mrb[1].mxu1 }
 0x201   :  { %v290_v34 = vpop.f32.mrb[2].mxu1 }
 0x202   :  { %v291_v35 = vadd.f32 %v430_v30, %v290_v34  ;;  %v505_v36 = vpop.f32.mrb[3].mxu1  ;;  %v294_v37 = vmax.f32 %v288_v32, 0.0 }
 0x204   :  { %v295_v38 = vmax.f32 %v291_v35, 0.0 }
 0x206   :  { %v296_v39 = vpack.c.bf16 %v295_v38, %v294_v37 }
 0x208   :  { %523 = vmatmul.mubr.bf16.vlgmr.msra.gmra.mrb[4].mxu0 %v296_v39 }
 0x2db   :  { %v402_v41 = vpop.f32.mrb[4].mxu0 }
 0x2dc   :  { %v524_v42 = vpop.f32.mrb[5].mxu0  ;;  %v403_v44 = vadd.f32 %v439_v40, %v402_v41 }
 0x2dd   :  { %v405_v43 = vpop.f32.mrb[6].mxu0 }
 0x2de   :  { %v406_v45 = vadd.f32 %v439_v40, %v405_v43  ;;  %v525_v46 = vpop.f32.mrb[7].mxu0 }
 0x2e0   :  { %v455_v47 = vpack.c.bf16 %v406_v45, %v403_v44 }
 0x2e2   :  { %456 = vst [vmem:[%s798_s7] sm:$0xff] %v455_v47  }
 0x2e3   :  { %423 = vsyncpa [#allocation3], 1 }
 0x2e4   :  { %424 = vsyncpa [#allocation5], 1 }
 0x2e5   :  { %425 = vsyncpa [#allocation8], 1 }

</bundles_post_ra>
